<compile_context>
chip_gen: v5e
topology: v5e:2x2
jax: 0.10.0
libtpu: 0.0.40
codegen_flags: <defaults>
</compile_context>

<pallas_src>
import functools

import jax
import jax.numpy as jnp
from jax.experimental import pallas as pl
from jax.experimental.pallas import tpu as pltpu


def make_positional_encoding(num_steps: int, embedding_dim: int) -> jnp.ndarray:
    """Deterministic sin/cos table, identical to the PyTorch __init__."""
    assert embedding_dim % 2 == 0, "embedding_dim must be even (sin/cos interleave)"
    pos = jnp.arange(num_steps, dtype=jnp.float32).reshape(-1, 1)               # (T, 1)
    div = jnp.power(
        10000.0,
        jnp.arange(0, embedding_dim, 2, dtype=jnp.float32) / embedding_dim,
    )                                                                            # (E/2,)
    angles = pos / div                                                           # (T, E/2)
    pe = jnp.zeros((1, num_steps, embedding_dim), dtype=jnp.float32)
    pe = pe.at[:, :, 0::2].set(jnp.sin(angles)[None])
    pe = pe.at[:, :, 1::2].set(jnp.cos(angles)[None])
    return pe


# ---------------------------------------------------------------------------
# Kernels: lane-dense 2D slabs.  x/out/bits blocks are (row_block, col_block);
# the position-table block is (1, col_block) and broadcasts over rows in-kernel.
# ---------------------------------------------------------------------------

def _pe_add_kernel(x_ref, pe_ref, o_ref):
    y = x_ref[...].astype(jnp.float32) + pe_ref[...].astype(jnp.float32)
    o_ref[...] = y.astype(o_ref.dtype)


def _pe_dropout_kernel(x_ref, pe_ref, bits_ref, o_ref, *, threshold: int, scale: float):
    y = x_ref[...].astype(jnp.float32) + pe_ref[...].astype(jnp.float32)
    # uint16 bit-stream; integer-space compare done in i32 for safe lowering.
    keep = bits_ref[...].astype(jnp.int32) >= jnp.int32(threshold)
    o_ref[...] = jnp.where(keep, y * jnp.float32(scale), jnp.float32(0.0)).astype(o_ref.dtype)


# ---------------------------------------------------------------------------
# Block/tile selection: lane-dense, ~2 MiB per stream per block.
# ---------------------------------------------------------------------------

def _pick_blocks(B: int, n_pad: int, itemsize: int, target_bytes: int = 2 << 20):
    """n_pad must already be a multiple of 128."""
    sub_step = {4: 8, 2: 16, 1: 32}.get(itemsize, 8)   # native sublane packing
    # Lane (last-dim) block: largest multiple of 128 dividing n_pad such that a
    # sub_step-row slab stays within the per-block byte budget.
    col_cap = max(128, target_bytes // (sub_step * itemsize))
    col_block = 128
    d = 128
    while d <= min(n_pad, col_cap):
        if n_pad % d == 0:
            col_block = d
        d += 128
    # Row (second-to-last) block: full B when it fits the budget, otherwise a
    # sub_step-multiple cap (preferring a divisor of B; Pallas pads a ragged last block).
    max_rows = max(sub_step, target_bytes // (col_block * itemsize))
    if B <= max_rows:
        row_block = B
    else:
        row_block = (max_rows // sub_step) * sub_step
        r = row_block
        while r >= sub_step:
            if B % r == 0:
                row_block = r
                break
            r -= sub_step
    return row_block, col_block


# ---------------------------------------------------------------------------
# Wrapper
# ---------------------------------------------------------------------------

def positional_encoding_forward(x: jnp.ndarray,
                                pe: jnp.ndarray,
                                *,
                                dropout_rate: float,
                                training: bool,
                                rng_key=None) -> jnp.ndarray:
    """x: (B, T, E), pe: (1, T, E) float32.  Returns dropout(x + pe)."""
    B, T, E = x.shape
    assert pe.shape == (1, T, E)
    N = T * E
    n_pad = ((N + 127) // 128) * 128

    # Lane-dense flattened views, padded to a multiple of 128 lanes.
    x2 = x.reshape(B, N)
    pe2 = pe.reshape(1, N).astype(x.dtype)               # stream table in activation dtype
    if n_pad != N:
        x2 = jnp.pad(x2, ((0, 0), (0, n_pad - N)))
        pe2 = jnp.pad(pe2, ((0, 0), (0, n_pad - N)))

    itemsize = x2.dtype.itemsize
    row_block, col_block = _pick_blocks(B, n_pad, itemsize)
    # Column blocks OUTER, row blocks INNER so the pe block (index (0, j)) is constant
    # across the inner loop and only re-fetched once per column block.
    grid = (n_pad // col_block, pl.cdiv(B, row_block))

    x_spec = pl.BlockSpec((row_block, col_block), lambda j, i: (i, j))
    pe_spec = pl.BlockSpec((1, col_block), lambda j, i: (0, j))
    out_spec = pl.BlockSpec((row_block, col_block), lambda j, i: (i, j))

    apply_dropout = training and dropout_rate > 0.0

    # Explicit scoped-VMEM budget: double-buffered x/out(/bits) blocks + pe block + headroom.
    blk = row_block * col_block
    needed = 2 * (2 * blk * itemsize
                  + (blk * 2 if apply_dropout else 0)
                  + col_block * pe2.dtype.itemsize)
    vmem_limit = int(min(max(16 << 20, needed + (4 << 20)), 48 << 20))
    cparams = pltpu.CompilerParams(
        dimension_semantics=("parallel", "parallel"),
        vmem_limit_bytes=vmem_limit,
    )

    if apply_dropout:
        if rng_key is None:
            rng_key = jax.random.PRNGKey(0)
        # TODO(synk): on hardware the in-kernel stateful PRNG (pltpu.prng_seed +
        # prng_random_bits) would remove this stream entirely; it previously failed to
        # lower in this environment, so a portable uint16 bit-stream is used instead.
        bits = jax.random.bits(rng_key, (B, n_pad), dtype=jnp.uint16)
        threshold = min(int(round(dropout_rate * 65536.0)), 65535)
        scale = 1.0 / (1.0 - dropout_rate)
        kernel = functools.partial(_pe_dropout_kernel, threshold=threshold, scale=scale)
        out2 = pl.pallas_call(
            kernel,
            out_shape=jax.ShapeDtypeStruct((B, n_pad), x.dtype),
            grid=grid,
            in_specs=[x_spec, pe_spec, x_spec],
            out_specs=out_spec,
            compiler_params=cparams,
        )(x2, pe2, bits)
    else:
        # TODO(synk): in a real model XLA fuses this bare broadcast-add for free; the
        # Pallas path is kept so the kernel itself is exercised and testable.
        out2 = pl.pallas_call(
            _pe_add_kernel,
            out_shape=jax.ShapeDtypeStruct((B, n_pad), x.dtype),
            grid=grid,
            in_specs=[x_spec, pe_spec],
            out_specs=out_spec,
            compiler_params=cparams,
        )(x2, pe2)

    if n_pad != N:
        out2 = out2[:, :N]
    return out2.reshape(B, T, E)


if __name__ == "__main__":
    batch = 2
    num_steps = 8
    embedding_dim = 32
    dropout_rate = 0.1

    key = jax.random.PRNGKey(0)
    kx, kd = jax.random.split(key)
    x = jax.random.normal(kx, (batch, num_steps, embedding_dim), dtype=jnp.float32)
    pe = make_positional_encoding(num_steps, embedding_dim)

    # Eval path (dropout = identity): deterministic, checked against plain JAX.
    out_eval = positional_encoding_forward(
        x, pe, dropout_rate=dropout_rate, training=False
    )
    # Train path: exercises the dropout kernel.
    out_train = positional_encoding_forward(
        x, pe, dropout_rate=dropout_rate, training=True, rng_key=kd
    )
    jax.block_until_ready((out_eval, out_train))

    ref = x + pe
    assert jnp.allclose(out_eval, ref, atol=1e-6), "eval mismatch vs reference"

    # Train check: every element is either dropped (0) or kept = (x+pe) / (1-p).
    scale = 1.0 / (1.0 - dropout_rate)
    kept = out_train != 0.0
    assert jnp.allclose(
        jnp.where(kept, out_train, 0.0),
        jnp.where(kept, ref * scale, 0.0),
        atol=1e-5,
    ), "train path values inconsistent with inverted dropout"
    assert out_train.shape == x.shape

    print("KERNEL_OK")
</pallas_src>

<mosaic_0001>
module attributes {stable_mosaic.version = 11 : i64} {
  func.func @_pe_add_kernel(%arg0: i32, %arg1: i32, %arg2: memref<2x256xf32, #tpu.memory_space<vmem>>, %arg3: memref<1x256xf32, #tpu.memory_space<vmem>>, %arg4: memref<2x256xf32, #tpu.memory_space<vmem>>) attributes {dimension_semantics = [#tpu.dimension_semantics<parallel>, #tpu.dimension_semantics<parallel>], iteration_bounds = array<i64: 1, 1>, scalar_prefetch = 0 : i64, scratch_operands = 0 : i64, tpu.core_type = #tpu.core_type<tc>, window_params = [{transform_indices = @transform_0, window_bounds = array<i64: 2, 256>}, {transform_indices = @transform_1, window_bounds = array<i64: 1, 256>}, {transform_indices = @transform_2, window_bounds = array<i64: 2, 256>}]} {
    %c0 = arith.constant 0 : index
    %c0_0 = arith.constant 0 : index
    %0 = vector.load %arg2[%c0, %c0_0] : memref<2x256xf32, #tpu.memory_space<vmem>>, vector<2x256xf32>
    %c0_1 = arith.constant 0 : index
    %c0_2 = arith.constant 0 : index
    %1 = vector.load %arg3[%c0_1, %c0_2] : memref<1x256xf32, #tpu.memory_space<vmem>>, vector<1x256xf32>
    %2 = vector.broadcast %1 : vector<1x256xf32> to vector<2x256xf32>
    %3 = arith.addf %0, %2 : vector<2x256xf32>
    %c0_3 = arith.constant 0 : index
    %c0_4 = arith.constant 0 : index
    %4 = vector.load %arg4[%c0_3, %c0_4] : memref<2x256xf32, #tpu.memory_space<vmem>>, vector<2x256xf32>
    tpu.vector_store %arg4[%c0_3, %c0_4], %3 {strides = array<i32>} : memref<2x256xf32, #tpu.memory_space<vmem>>, vector<2x256xf32>,
    return
  }
  func.func @transform_0(%arg0: i32, %arg1: i32) -> (i32, i32) {
    %c0_i32 = arith.constant 0 : i32
    return %arg1, %arg0 : i32, i32
  }
  func.func @transform_1(%arg0: i32, %arg1: i32) -> (i32, i32) {
    %c0_i32 = arith.constant 0 : i32
    %c0_i32_0 = arith.constant 0 : i32
    return %c0_i32, %arg0 : i32, i32
  }
  func.func @transform_2(%arg0: i32, %arg1: i32) -> (i32, i32) {
    %c0_i32 = arith.constant 0 : i32
    return %arg1, %arg0 : i32, i32
  }
}

</mosaic_0001>

<bundles_post_ra>
// kernel: tpu_custom_call.1
= control target key start
LH: loop header
LB: loop body
LE: loop exit
PB: predicated region body
PF: predicated region fallthrough
CT: control target
= control target key end

     0   :  { %7 = vsyncpa [#allocation3], 0  ;;  %s177_s0 = inlined_call_operand.hbm [shape: f32[2,256], index: 0, kind: input, shape index: {}]   ;;  %s178_s1 = inlined_call_operand.hbm [shape: f32[1,256], index: 1, kind: input, shape index: {}]   ;;  %s179_s2 = inlined_call_operand.hbm [shape: f32[2,256], index: 2, kind: output, shape index: {}]  }
   0x1   :  { %8 = vsyncpa [#allocation6], 0 }
   0x2   :  { %9 = vsyncpa [#allocation4], 0  ;;  %s15_s11 = sshll.u32 %s177_s0, 4  ;;  %s150_s12 = smov [#allocation2]   ;;  %s16_s11 = int_to_ptr.hbm [resolvable:$true] %s15_s11 }
   0x3   :  { %s17_s13 = sshll.u32 %s150_s12, 4  ;;  %s26_s16 = sshll.u32 %s178_s1, 4  ;;  %s18_s13 = int_to_ptr.vmem [resolvable:$true] %s17_s13  ;;  %s27_s16 = int_to_ptr.hbm [resolvable:$true] %s26_s16 }
   0x4   :  { %20 = dma.hbm_to_vmem [thread:$0]  %s16_s11, 64, %s18_s13, [#allocation3]  }
   0x5   :  { %s151_s17 = smov [#allocation5]  }
   0x6   :  { %s28_s18 = sshll.u32 %s151_s17, 4  ;;  %s29_s18 = int_to_ptr.vmem [resolvable:$true] %s28_s18 }
   0x7   :  { %31 = dma.hbm_to_vmem [thread:$0]  %s27_s16, 32, %s29_s18, [#allocation6]  }
   0x8   :  { %144 = dma.done.wait [#allocation3], 64  }
   0x9   :  { %145 = vsyncadd [#allocation3], 4294967232 }
   0xa   :  { %146 = dma.done.wait [#allocation6], 32  }
   0xb   :  { %147 = vsyncadd [#allocation6], 4294967264  ;;  %v41_v0 = vld [vmem:[#allocation5] sm:$0x3]  ;;  %vm46_vm0 = vcmask 1041408   ;;  %s152_s0 = smov [#allocation7]  }
   0xc   :  { %v43_v1 = vperm.slane %v41_v0, 0  ;;  %v44_v2 = vperm.slane %v41_v0, 1  ;;  %v40_v3 = vld [vmem:[#allocation2] sm:$0xf]  ;;  %s56_s19 = sshll.u32 %s152_s0, 4  ;;  %s58_s21 = sshll.u32 %s179_s2, 4  ;;  %s57_s19 = int_to_ptr.vmem [resolvable:$true] %s56_s19  ;;  %s59_s21 = int_to_ptr.hbm [resolvable:$true] %s58_s21 }
   0xe   :  { %v45_v4 = vrot.slane %v44_v2, 6 }
  0x10   :  { %v47_v5 = vsel %vm46_vm0, %v43_v1, %v45_v4 }
  0x11   :  { %v49_v6 = vadd.f32 %v47_v5, %v40_v3 }
  0x13   :  { %50 = vst [vmem:[#allocation7] sm:$0xf] %v49_v6 }
  0x14   :  { %61 = dma.vmem_to_hbm [thread:$0]  %s57_s19, 64, %s59_s21, [#allocation4]  }
  0x15   :  { %148 = dma.done.wait [#allocation4], 64  }
  0x16   :  { %149 = vsyncadd [#allocation4], 4294967232 }
  0x17   :  { %66 = vsyncpa [#allocation3], 1 }
  0x18   :  { %67 = vsyncpa [#allocation6], 1 }
  0x19   :  { %68 = vsyncpa [#allocation4], 1 }

</bundles_post_ra>
